<compile_context>
chip_gen: v6e
topology: v6e:2x2x1
jax: 0.10.0
libtpu: 0.0.40
codegen_flags: <defaults>
</compile_context>

<pallas_src>
import jax
import jax.numpy as jnp
from jax import lax
from jax.experimental import pallas as pl
from jax.experimental.pallas import tpu as pltpu


# ----------------------------- Pallas kernel ------------------------------- #

def _make_dense_block_kernel(num_layers, c_in, growth, c_mid, K, L, NB, pad,
                             w1_off, w2_off):
    """Build the fused DenseBlock kernel for static hyper-parameters."""
    Lpp = L + 2 * pad            # per-item padded length
    Wp = NB * Lpp                # lane width of the padded feature layout
    Wv = Wp - 2 * pad            # lane width of every matmul / conv output
    c_total = c_in + num_layers * growth

    def kernel(x_ref, w_ref, b_ref, o_ref, xcol_ref, hbuf_ref):
        bf16 = jnp.bfloat16

        # Validity mask over the lane-packed batch: item n's true output columns
        # are [n*Lpp, n*Lpp+L); the 2*pad columns between items are garbage from
        # running one wide "valid" conv over the whole slab and are forced to zero
        # so they double as the next conv's zero padding.  Built once per step.
        lane = lax.broadcasted_iota(jnp.int32, (1, Wv), 1)
        valid = lane < 0
        for n in range(NB):
            valid = jnp.logical_or(
                valid, jnp.logical_and(lane >= n * Lpp, lane < n * Lpp + L))

        # Zero only the tiny outer pad columns that nothing below writes.
        o_ref[c_in:c_total, 0:pad] = jnp.zeros((c_total - c_in, pad), o_ref.dtype)
        o_ref[c_in:c_total, pad + Wv:Wp] = jnp.zeros((c_total - c_in, pad), o_ref.dtype)
        hbuf_ref[:, 0:pad] = jnp.zeros((c_mid, pad), bf16)
        hbuf_ref[:, pad + Wv:Wp] = jnp.zeros((c_mid, pad), bf16)

        # Input channels: one full-width copy into the output block (the wrapper
        # already zero-padded each item) and their K shifted taps appended to the
        # persistent im2col scratch (rows: segment-major, tap-major, channel-minor).
        o_ref[0:c_in, :] = x_ref[...]
        for k in range(K):
            xcol_ref[k * c_in:(k + 1) * c_in, :] = x_ref[:, k:k + Wv].astype(bf16)

        for l in range(num_layers):                      # static unroll over layers
            cin_l = c_in + l * growth
            rows_l = K * cin_l
            w1 = w_ref[0:c_mid, w1_off[l]:w1_off[l] + rows_l]       # (c_mid, K*cin_l) bf16
            b1 = b_ref[0:c_mid, 2 * l:2 * l + 1]                    # (c_mid, 1)       f32
            w2 = w_ref[0:growth, w2_off[l]:w2_off[l] + K * c_mid]   # (growth, K*c_mid) bf16
            b2 = b_ref[0:growth, 2 * l + 1:2 * l + 2]               # (growth, 1)      f32

            # conv1 + ReLU: one MXU matmul over the incrementally built im2col.
            h = jnp.dot(w1, xcol_ref[0:rows_l, :],
                        preferred_element_type=jnp.float32) + b1
            h = jnp.where(valid, jnp.maximum(h, 0.0), 0.0)          # (c_mid, Wv) f32

            # Stage h in the padded layout (bf16) so conv2's taps are plain slices.
            hbuf_ref[:, pad:pad + Wv] = h.astype(bf16)
            hcol = jnp.concatenate([hbuf_ref[:, k:k + Wv] for k in range(K)], axis=0)

            # conv2 + ReLU.
            out = jnp.dot(w2, hcol, preferred_element_type=jnp.float32) + b2
            out = jnp.where(valid, jnp.maximum(out, 0.0), 0.0)      # (growth, Wv) f32
            # TODO(synk): nn.Dropout(p=0.2) is treated as inference-mode identity
            # (stochastic training-mode dropout is not reproduced in the kernel).

            # Channel concat: write the new rows once (f32) into the output block.
            o_ref[cin_l:cin_l + growth, pad:pad + Wv] = out.astype(o_ref.dtype)

            # Append the K shifted taps of the new channels (bf16) for later layers.
            if l + 1 < num_layers:
                for k in range(K):
                    xcol_ref[rows_l + k * growth:rows_l + (k + 1) * growth, :] = (
                        o_ref[cin_l:cin_l + growth, k:k + Wv].astype(bf16))

    return kernel


# ------------------------------- wrapper ------------------------------------ #

def dense_block(x, params, nb=None):
    """Run the whole DenseBlock as one fused pallas_call, batch-blocked on lanes."""
    N, C_in, L = x.shape
    num_layers = len(params)
    c_mid, _, K = params[0][0].shape
    growth = params[0][2].shape[0]
    assert K % 2 == 1, "padding='same' implemented for odd kernel_size (PyTorch parity)"
    pad = (K - 1) // 2
    Lpp = L + 2 * pad
    C_total = C_in + num_layers * growth

    # Batch-block size: pack NB items along lanes so the matmul / writeback lane
    # width approaches 128-512 (v5e MXU fill at 128, v6e/v7x sweet spot 256+) while
    # dividing N.  Tiny batches simply use NB = N.
    if nb is None:
        nb = 1
        for cand in range(1, N + 1):
            if N % cand == 0 and cand * Lpp <= 512:
                nb = cand
    NB = nb
    assert N % NB == 0
    num_blocks = N // NB
    Wp = NB * Lpp
    Wv = Wp - 2 * pad

    # Input: (N, C, L) -> (blocks, C, NB*Lpp), zero-padded per item, lane-packed.
    xp = x.reshape(num_blocks, NB, C_in, L).transpose(0, 2, 1, 3)
    xp = jnp.pad(xp, ((0, 0), (0, 0), (0, 0), (pad, pad)))
    xp = xp.reshape(num_blocks, C_in, Wp)

    # Pack all conv weights into one bf16 slab and all biases into one f32 slab.
    # Conv1 columns are ordered segment-major / tap-major / channel-minor so each
    # layer's new channels append contiguously to the in-kernel im2col scratch.
    seg_sizes = [C_in] + [growth] * (num_layers - 1)
    w1_off, w2_off = [], []
    col = 0
    for l in range(num_layers):
        w1_off.append(col); col += K * (C_in + l * growth)
        w2_off.append(col); col += K * c_mid
    WC = col
    WR = max(c_mid, growth)
    wslab = jnp.zeros((WR, WC), jnp.float32)
    bslab = jnp.zeros((WR, 2 * num_layers), jnp.float32)
    for l, (w1, b1, w2, b2) in enumerate(params):
        assert w1.shape == (c_mid, C_in + l * growth, K)
        cols, ch = [], 0
        for s in range(l + 1):
            cs = seg_sizes[s]
            wseg = w1[:, ch:ch + cs, :]                                  # (c_mid, cs, K)
            cols.append(jnp.transpose(wseg, (0, 2, 1)).reshape(c_mid, K * cs))
            ch += cs
        w1f = jnp.concatenate(cols, axis=1)                              # (c_mid, K*cin_l)
        w2f = jnp.transpose(w2, (0, 2, 1)).reshape(growth, K * c_mid)    # (growth, K*c_mid)
        wslab = wslab.at[0:c_mid, w1_off[l]:w1_off[l] + w1f.shape[1]].set(w1f)
        wslab = wslab.at[0:growth, w2_off[l]:w2_off[l] + w2f.shape[1]].set(w2f)
        bslab = bslab.at[0:c_mid, 2 * l].set(b1)
        bslab = bslab.at[0:growth, 2 * l + 1].set(b2)
    wslab = wslab.astype(jnp.bfloat16)

    kernel = _make_dense_block_kernel(num_layers, C_in, growth, c_mid, K, L, NB, pad,
                                      tuple(w1_off), tuple(w2_off))
    xcol_rows = K * (C_in + (num_layers - 1) * growth)

    out_p = pl.pallas_call(
        kernel,
        out_shape=jax.ShapeDtypeStruct((num_blocks, C_total, Wp), x.dtype),
        grid=(num_blocks,),
        in_specs=[
            pl.BlockSpec((None, C_in, Wp), lambda n: (n, 0, 0)),
            pl.BlockSpec((WR, WC), lambda n: (0, 0)),
            pl.BlockSpec((WR, 2 * num_layers), lambda n: (0, 0)),
        ],
        out_specs=pl.BlockSpec((None, C_total, Wp), lambda n: (n, 0, 0)),
        scratch_shapes=[
            pltpu.VMEM((xcol_rows, Wv), jnp.bfloat16),   # persistent incremental im2col
            pltpu.VMEM((c_mid, Wp), jnp.bfloat16),       # padded hidden staging buffer
        ],
        compiler_params=pltpu.CompilerParams(
            dimension_semantics=("parallel",),           # v7x: shard batch over 2 TCs
            vmem_limit_bytes=32 * 1024 * 1024,           # re-derive if NB/L scale up
        ),
    )(xp, wslab, bslab)

    # (blocks, C_total, NB*Lpp) -> (N, C_total, L): unpack lanes, drop per-item pads.
    out = out_p.reshape(num_blocks, C_total, NB, Lpp).transpose(0, 2, 1, 3)
    out = out.reshape(N, C_total, Lpp)[:, :, pad:pad + L]
    return out


# --------------------------- parameter init -------------------------------- #

def init_conv_params(key, c_in, c_out, k):
    """Deterministic PyTorch-style uniform init (bound = 1/sqrt(fan_in))."""
    k_w, k_b = jax.random.split(key)
    bound = 1.0 / float(c_in * k) ** 0.5
    w = jax.random.uniform(k_w, (c_out, c_in, k), jnp.float32, -bound, bound)
    b = jax.random.uniform(k_b, (c_out,), jnp.float32, -bound, bound)
    return w, b


def init_dense_block_params(key, c_in, num_layers, growth_rate, R, kernel_size):
    params = []
    for layer_idx in range(num_layers):
        key, k1, k2 = jax.random.split(key, 3)
        cin_l = c_in + layer_idx * growth_rate
        w1, b1 = init_conv_params(k1, cin_l, growth_rate * R, kernel_size)
        w2, b2 = init_conv_params(k2, growth_rate * R, growth_rate, kernel_size)
        params.append((w1, b1, w2, b2))
    return params


# --------------------------- pure-JAX reference ----------------------------- #

def _conv1d_same_ref(x, w, b):
    # Same mixed precision as the kernel: bf16 operands, f32 accumulation.
    out = lax.conv_general_dilated(
        x.astype(jnp.bfloat16), w.astype(jnp.bfloat16),
        window_strides=(1,), padding="SAME",
        dimension_numbers=("NCH", "OIH", "NCH"),
        preferred_element_type=jnp.float32)
    return out + b[None, :, None]


def dense_block_ref(x, params):
    feat = x
    for (w1, b1, w2, b2) in params:
        h = jax.nn.relu(_conv1d_same_ref(feat, w1, b1))
        o = jax.nn.relu(_conv1d_same_ref(h, w2, b2))
        feat = jnp.concatenate([feat, o], axis=1)   # dropout = identity in eval mode
    return feat


# ---------------------------------- main ------------------------------------ #

if __name__ == "__main__":
    # Module hyper-params (DenseBlock defaults): num_layers=4, growth_rate=4,
    # R=1, kernel_size=3, act_fn=ReLU, drop_rate=0.2 (eval-mode identity).
    N, C_IN, L = 2, 4, 16
    NUM_LAYERS, GROWTH, R, K = 4, 4, 1, 3

    key = jax.random.PRNGKey(0)
    key, kx = jax.random.split(key)
    x = jax.random.normal(kx, (N, C_IN, L), jnp.float32)

    params = init_dense_block_params(key, C_IN, NUM_LAYERS, GROWTH, R, K)

    out = jax.block_until_ready(dense_block(x, params))
    ref = jax.block_until_ready(dense_block_ref(x, params))

    assert out.shape == (N, C_IN + NUM_LAYERS * GROWTH, L), out.shape
    max_err = float(jnp.max(jnp.abs(out - ref)))
    assert jnp.allclose(out, ref, atol=2e-3, rtol=2e-3), max_err
    print("KERNEL_OK")
</pallas_src>

<mosaic_0001>
module attributes {stable_mosaic.version = 11 : i64} {
  func.func @kernel(%arg0: i32, %arg1: memref<1x4x36xf32, #tpu.memory_space<vmem>>, %arg2: memref<4x168xbf16, #tpu.memory_space<vmem>>, %arg3: memref<4x8xf32, #tpu.memory_space<vmem>>, %arg4: memref<1x20x36xf32, #tpu.memory_space<vmem>>, %arg5: memref<48x34xbf16, #tpu.memory_space<vmem>>, %arg6: memref<4x36xbf16, #tpu.memory_space<vmem>>) attributes {dimension_semantics = [#tpu.dimension_semantics<parallel>], iteration_bounds = array<i64: 1>, scalar_prefetch = 0 : i64, scratch_operands = 2 : i64, tpu.core_type = #tpu.core_type<tc>, window_params = [{transform_indices = @transform_0, window_bounds = array<i64: 1, 4, 36>}, {pipeline_mode = #tpu.pipeline_mode<synchronous>, transform_indices = @transform_1, window_bounds = array<i64: 4, 168>}, {pipeline_mode = #tpu.pipeline_mode<synchronous>, transform_indices = @transform_2, window_bounds = array<i64: 4, 8>}, {transform_indices = @transform_3, window_bounds = array<i64: 1, 20, 36>}]} {
    %0 = tpu.iota {dimensions = array<i32: 1>} : vector<1x34xi32>
    %c0_i32 = arith.constant 0 : i32
    %1 = vector.broadcast %c0_i32 : i32 to vector<1x34xi32>
    %2 = arith.cmpi slt, %0, %1 : vector<1x34xi32>
    %c0_i32_0 = arith.constant 0 : i32
    %3 = vector.broadcast %c0_i32_0 : i32 to vector<1x34xi32>
    %4 = arith.cmpi sge, %0, %3 : vector<1x34xi32>
    %c16_i32 = arith.constant 16 : i32
    %5 = vector.broadcast %c16_i32 : i32 to vector<1x34xi32>
    %6 = arith.cmpi slt, %0, %5 : vector<1x34xi32>
    %7 = arith.andi %4, %6 : vector<1x34xi1>
    %8 = arith.ori %2, %7 : vector<1x34xi1>
    %c18_i32 = arith.constant 18 : i32
    %9 = vector.broadcast %c18_i32 : i32 to vector<1x34xi32>
    %10 = arith.cmpi sge, %0, %9 : vector<1x34xi32>
    %c34_i32 = arith.constant 34 : i32
    %11 = vector.broadcast %c34_i32 : i32 to vector<1x34xi32>
    %12 = arith.cmpi slt, %0, %11 : vector<1x34xi32>
    %13 = arith.andi %10, %12 : vector<1x34xi1>
    %14 = arith.ori %8, %13 : vector<1x34xi1>
    %cst = arith.constant 0.000000e+00 : f32
    %15 = vector.broadcast %cst : f32 to vector<16x1xf32>
    %c0 = arith.constant 0 : index
    %c4 = arith.constant 4 : index
    %c0_1 = arith.constant 0 : index
    %16 = vector.load %arg4[%c0, %c4, %c0_1] : memref<1x20x36xf32, #tpu.memory_space<vmem>>, vector<1x16x1xf32>
    %17 = vector.shape_cast %16 : vector<1x16x1xf32> to vector<16x1xf32>
    %18 = vector.shape_cast %15 : vector<16x1xf32> to vector<1x16x1xf32>
    tpu.vector_store %arg4[%c0, %c4, %c0_1], %18 {strides = array<i32>} : memref<1x20x36xf32, #tpu.memory_space<vmem>>, vector<1x16x1xf32>,
    %cst_2 = arith.constant 0.000000e+00 : f32
    %19 = vector.broadcast %cst_2 : f32 to vector<16x1xf32>
    %c0_3 = arith.constant 0 : index
    %c4_4 = arith.constant 4 : index
    %c35 = arith.constant 35 : index
    %20 = vector.load %arg4[%c0_3, %c4_4, %c35] : memref<1x20x36xf32, #tpu.memory_space<vmem>>, vector<1x16x1xf32>
    %21 = vector.shape_cast %20 : vector<1x16x1xf32> to vector<16x1xf32>
    %22 = vector.shape_cast %19 : vector<16x1xf32> to vector<1x16x1xf32>
    tpu.vector_store %arg4[%c0_3, %c4_4, %c35], %22 {strides = array<i32>} : memref<1x20x36xf32, #tpu.memory_space<vmem>>, vector<1x16x1xf32>,
    %cst_5 = arith.constant 0.000000e+00 : bf16
    %23 = vector.broadcast %cst_5 : bf16 to vector<4x1xbf16>
    %c0_6 = arith.constant 0 : index
    %c0_7 = arith.constant 0 : index
    %24 = vector.load %arg6[%c0_6, %c0_7] : memref<4x36xbf16, #tpu.memory_space<vmem>>, vector<4x1xbf16>
    tpu.vector_store %arg6[%c0_6, %c0_7], %23 {strides = array<i32>} : memref<4x36xbf16, #tpu.memory_space<vmem>>, vector<4x1xbf16>,
    %cst_8 = arith.constant 0.000000e+00 : bf16
    %25 = vector.broadcast %cst_8 : bf16 to vector<4x1xbf16>
    %c0_9 = arith.constant 0 : index
    %c35_10 = arith.constant 35 : index
    %26 = vector.load %arg6[%c0_9, %c35_10] : memref<4x36xbf16, #tpu.memory_space<vmem>>, vector<4x1xbf16>
    tpu.vector_store %arg6[%c0_9, %c35_10], %25 {strides = array<i32>} : memref<4x36xbf16, #tpu.memory_space<vmem>>, vector<4x1xbf16>,
    %c0_11 = arith.constant 0 : index
    %c0_12 = arith.constant 0 : index
    %c0_13 = arith.constant 0 : index
    %27 = vector.load %arg1[%c0_11, %c0_12, %c0_13] : memref<1x4x36xf32, #tpu.memory_space<vmem>>, vector<1x4x36xf32>
    %28 = vector.shape_cast %27 : vector<1x4x36xf32> to vector<4x36xf32>
    %c0_14 = arith.constant 0 : index
    %c0_15 = arith.constant 0 : index
    %c0_16 = arith.constant 0 : index
    %29 = vector.load %arg4[%c0_14, %c0_15, %c0_16] : memref<1x20x36xf32, #tpu.memory_space<vmem>>, vector<1x4x36xf32>
    %30 = vector.shape_cast %29 : vector<1x4x36xf32> to vector<4x36xf32>
    %31 = vector.shape_cast %28 : vector<4x36xf32> to vector<1x4x36xf32>
    tpu.vector_store %arg4[%c0_14, %c0_15, %c0_16], %31 {strides = array<i32>} : memref<1x20x36xf32, #tpu.memory_space<vmem>>, vector<1x4x36xf32>,
    %c0_17 = arith.constant 0 : index
    %c0_18 = arith.constant 0 : index
    %c0_19 = arith.constant 0 : index
    %32 = vector.load %arg1[%c0_17, %c0_18, %c0_19] : memref<1x4x36xf32, #tpu.memory_space<vmem>>, vector<1x4x34xf32>
    %33 = vector.shape_cast %32 : vector<1x4x34xf32> to vector<4x34xf32>
    %34 = arith.truncf %33 : vector<4x34xf32> to vector<4x34xbf16>
    %c0_20 = arith.constant 0 : index
    %c0_21 = arith.constant 0 : index
    %35 = vector.load %arg5[%c0_20, %c0_21] : memref<48x34xbf16, #tpu.memory_space<vmem>>, vector<4x34xbf16>
    tpu.vector_store %arg5[%c0_20, %c0_21], %34 {strides = array<i32>} : memref<48x34xbf16, #tpu.memory_space<vmem>>, vector<4x34xbf16>,
    %c0_22 = arith.constant 0 : index
    %c0_23 = arith.constant 0 : index
    %c1 = arith.constant 1 : index
    %36 = vector.load %arg1[%c0_22, %c0_23, %c1] : memref<1x4x36xf32, #tpu.memory_space<vmem>>, vector<1x4x34xf32>
    %37 = vector.shape_cast %36 : vector<1x4x34xf32> to vector<4x34xf32>
    %38 = arith.truncf %37 : vector<4x34xf32> to vector<4x34xbf16>
    %c4_24 = arith.constant 4 : index
    %c0_25 = arith.constant 0 : index
    %39 = vector.load %arg5[%c4_24, %c0_25] : memref<48x34xbf16, #tpu.memory_space<vmem>>, vector<4x34xbf16>
    tpu.vector_store %arg5[%c4_24, %c0_25], %38 {strides = array<i32>} : memref<48x34xbf16, #tpu.memory_space<vmem>>, vector<4x34xbf16>,
    %c0_26 = arith.constant 0 : index
    %c0_27 = arith.constant 0 : index
    %c2 = arith.constant 2 : index
    %40 = vector.load %arg1[%c0_26, %c0_27, %c2] : memref<1x4x36xf32, #tpu.memory_space<vmem>>, vector<1x4x34xf32>
    %41 = vector.shape_cast %40 : vector<1x4x34xf32> to vector<4x34xf32>
    %42 = arith.truncf %41 : vector<4x34xf32> to vector<4x34xbf16>
    %c8 = arith.constant 8 : index
    %c0_28 = arith.constant 0 : index
    %43 = vector.load %arg5[%c8, %c0_28] : memref<48x34xbf16, #tpu.memory_space<vmem>>, vector<4x34xbf16>
    tpu.vector_store %arg5[%c8, %c0_28], %42 {strides = array<i32>} : memref<48x34xbf16, #tpu.memory_space<vmem>>, vector<4x34xbf16>,
    %c0_29 = arith.constant 0 : index
    %c0_30 = arith.constant 0 : index
    %44 = vector.load %arg2[%c0_29, %c0_30] : memref<4x168xbf16, #tpu.memory_space<vmem>>, vector<4x12xbf16>
    %c0_31 = arith.constant 0 : index
    %c0_32 = arith.constant 0 : index
    %45 = vector.load %arg3[%c0_31, %c0_32] : memref<4x8xf32, #tpu.memory_space<vmem>>, vector<4x1xf32>
    %c0_33 = arith.constant 0 : index
    %c12 = arith.constant 12 : index
    %46 = vector.load %arg2[%c0_33, %c12] : memref<4x168xbf16, #tpu.memory_space<vmem>>, vector<4x12xbf16>
    %c0_34 = arith.constant 0 : index
    %c1_35 = arith.constant 1 : index
    %47 = vector.load %arg3[%c0_34, %c1_35] : memref<4x8xf32, #tpu.memory_space<vmem>>, vector<4x1xf32>
    %c0_36 = arith.constant 0 : index
    %c0_37 = arith.constant 0 : index
    %48 = vector.load %arg5[%c0_36, %c0_37] : memref<48x34xbf16, #tpu.memory_space<vmem>>, vector<12x34xbf16>
    %cst_38 = arith.constant dense<0.000000e+00> : vector<4x34xf32>
    %49 = tpu.matmul %44, %48, %cst_38 {dimension_numbers = #tpu.dot_dimension_numbers<[1], [0], [0], [1], [0, 0, 1, 1], [], []>} : vector<4x12xbf16>, vector<12x34xbf16>, vector<4x34xf32> -> vector<4x34xf32>
    %50 = vector.broadcast %45 : vector<4x1xf32> to vector<4x34xf32>
    %51 = arith.addf %49, %50 : vector<4x34xf32>
    %cst_39 = arith.constant 0.000000e+00 : f32
    %52 = vector.broadcast %cst_39 : f32 to vector<4x34xf32>
    %53 = arith.maximumf %51, %52 : vector<4x34xf32>
    %cst_40 = arith.constant 0.000000e+00 : f32
    %54 = vector.shape_cast %14 : vector<1x34xi1> to vector<1x34xi1>
    %55 = vector.broadcast %54 : vector<1x34xi1> to vector<4x34xi1>
    %56 = vector.broadcast %cst_40 : f32 to vector<4x34xf32>
    %57 = arith.select %55, %53, %56 : vector<4x34xi1>, vector<4x34xf32>
    %58 = arith.truncf %57 : vector<4x34xf32> to vector<4x34xbf16>
    %c0_41 = arith.constant 0 : index
    %c1_42 = arith.constant 1 : index
    %59 = vector.load %arg6[%c0_41, %c1_42] : memref<4x36xbf16, #tpu.memory_space<vmem>>, vector<4x34xbf16>
    tpu.vector_store %arg6[%c0_41, %c1_42], %58 {strides = array<i32>} : memref<4x36xbf16, #tpu.memory_space<vmem>>, vector<4x34xbf16>,
    %c0_43 = arith.constant 0 : index
    %c0_44 = arith.constant 0 : index
    %60 = vector.load %arg6[%c0_43, %c0_44] : memref<4x36xbf16, #tpu.memory_space<vmem>>, vector<4x34xbf16>
    %c0_45 = arith.constant 0 : index
    %c1_46 = arith.constant 1 : index
    %61 = vector.load %arg6[%c0_45, %c1_46] : memref<4x36xbf16, #tpu.memory_space<vmem>>, vector<4x34xbf16>
    %c0_47 = arith.constant 0 : index
    %c2_48 = arith.constant 2 : index
    %62 = vector.load %arg6[%c0_47, %c2_48] : memref<4x36xbf16, #tpu.memory_space<vmem>>, vector<4x34xbf16>
    %63 = tpu.concatenate %60, %61, %62 in 0 : vector<4x34xbf16>, vector<4x34xbf16>, vector<4x34xbf16> -> vector<12x34xbf16>
    %cst_49 = arith.constant dense<0.000000e+00> : vector<4x34xf32>
    %64 = tpu.matmul %46, %63, %cst_49 {dimension_numbers = #tpu.dot_dimension_numbers<[1], [0], [0], [1], [0, 0, 1, 1], [], []>} : vector<4x12xbf16>, vector<12x34xbf16>, vector<4x34xf32> -> vector<4x34xf32>
    %65 = vector.broadcast %47 : vector<4x1xf32> to vector<4x34xf32>
    %66 = arith.addf %64, %65 : vector<4x34xf32>
    %cst_50 = arith.constant 0.000000e+00 : f32
    %67 = vector.broadcast %cst_50 : f32 to vector<4x34xf32>
    %68 = arith.maximumf %66, %67 : vector<4x34xf32>
    %cst_51 = arith.constant 0.000000e+00 : f32
    %69 = vector.shape_cast %14 : vector<1x34xi1> to vector<1x34xi1>
    %70 = vector.broadcast %69 : vector<1x34xi1> to vector<4x34xi1>
    %71 = vector.broadcast %cst_51 : f32 to vector<4x34xf32>
    %72 = arith.select %70, %68, %71 : vector<4x34xi1>, vector<4x34xf32>
    %c0_52 = arith.constant 0 : index
    %c4_53 = arith.constant 4 : index
    %c1_54 = arith.constant 1 : index
    %73 = vector.load %arg4[%c0_52, %c4_53, %c1_54] : memref<1x20x36xf32, #tpu.memory_space<vmem>>, vector<1x4x34xf32>
    %74 = vector.shape_cast %73 : vector<1x4x34xf32> to vector<4x34xf32>
    %75 = vector.shape_cast %72 : vector<4x34xf32> to vector<1x4x34xf32>
    tpu.vector_store %arg4[%c0_52, %c4_53, %c1_54], %75 {strides = array<i32>} : memref<1x20x36xf32, #tpu.memory_space<vmem>>, vector<1x4x34xf32>,
    %c0_55 = arith.constant 0 : index
    %c4_56 = arith.constant 4 : index
    %c0_57 = arith.constant 0 : index
    %76 = vector.load %arg4[%c0_55, %c4_56, %c0_57] : memref<1x20x36xf32, #tpu.memory_space<vmem>>, vector<1x4x34xf32>
    %77 = vector.shape_cast %76 : vector<1x4x34xf32> to vector<4x34xf32>
    %78 = arith.truncf %77 : vector<4x34xf32> to vector<4x34xbf16>
    %c12_58 = arith.constant 12 : index
    %c0_59 = arith.constant 0 : index
    %79 = vector.load %arg5[%c12_58, %c0_59] : memref<48x34xbf16, #tpu.memory_space<vmem>>, vector<4x34xbf16>
    tpu.vector_store %arg5[%c12_58, %c0_59], %78 {strides = array<i32>} : memref<48x34xbf16, #tpu.memory_space<vmem>>, vector<4x34xbf16>,
    %c0_60 = arith.constant 0 : index
    %c4_61 = arith.constant 4 : index
    %c1_62 = arith.constant 1 : index
    %80 = vector.load %arg4[%c0_60, %c4_61, %c1_62] : memref<1x20x36xf32, #tpu.memory_space<vmem>>, vector<1x4x34xf32>
    %81 = vector.shape_cast %80 : vector<1x4x34xf32> to vector<4x34xf32>
    %82 = arith.truncf %81 : vector<4x34xf32> to vector<4x34xbf16>
    %c16 = arith.constant 16 : index
    %c0_63 = arith.constant 0 : index
    %83 = vector.load %arg5[%c16, %c0_63] : memref<48x34xbf16, #tpu.memory_space<vmem>>, vector<4x34xbf16>
    tpu.vector_store %arg5[%c16, %c0_63], %82 {strides = array<i32>} : memref<48x34xbf16, #tpu.memory_space<vmem>>, vector<4x34xbf16>,
    %c0_64 = arith.constant 0 : index
    %c4_65 = arith.constant 4 : index
    %c2_66 = arith.constant 2 : index
    %84 = vector.load %arg4[%c0_64, %c4_65, %c2_66] : memref<1x20x36xf32, #tpu.memory_space<vmem>>, vector<1x4x34xf32>
    %85 = vector.shape_cast %84 : vector<1x4x34xf32> to vector<4x34xf32>
    %86 = arith.truncf %85 : vector<4x34xf32> to vector<4x34xbf16>
    %c20 = arith.constant 20 : index
    %c0_67 = arith.constant 0 : index
    %87 = vector.load %arg5[%c20, %c0_67] : memref<48x34xbf16, #tpu.memory_space<vmem>>, vector<4x34xbf16>
    tpu.vector_store %arg5[%c20, %c0_67], %86 {strides = array<i32>} : memref<48x34xbf16, #tpu.memory_space<vmem>>, vector<4x34xbf16>,
    %c0_68 = arith.constant 0 : index
    %c24 = arith.constant 24 : index
    %88 = vector.load %arg2[%c0_68, %c24] : memref<4x168xbf16, #tpu.memory_space<vmem>>, vector<4x24xbf16>
    %c0_69 = arith.constant 0 : index
    %c2_70 = arith.constant 2 : index
    %89 = vector.load %arg3[%c0_69, %c2_70] : memref<4x8xf32, #tpu.memory_space<vmem>>, vector<4x1xf32>
    %c0_71 = arith.constant 0 : index
    %c48 = arith.constant 48 : index
    %90 = vector.load %arg2[%c0_71, %c48] : memref<4x168xbf16, #tpu.memory_space<vmem>>, vector<4x12xbf16>
    %c0_72 = arith.constant 0 : index
    %c3 = arith.constant 3 : index
    %91 = vector.load %arg3[%c0_72, %c3] : memref<4x8xf32, #tpu.memory_space<vmem>>, vector<4x1xf32>
    %c0_73 = arith.constant 0 : index
    %c0_74 = arith.constant 0 : index
    %92 = vector.load %arg5[%c0_73, %c0_74] : memref<48x34xbf16, #tpu.memory_space<vmem>>, vector<24x34xbf16>
    %cst_75 = arith.constant dense<0.000000e+00> : vector<4x34xf32>
    %93 = tpu.matmul %88, %92, %cst_75 {dimension_numbers = #tpu.dot_dimension_numbers<[1], [0], [0], [1], [0, 0, 1, 1], [], []>} : vector<4x24xbf16>, vector<24x34xbf16>, vector<4x34xf32> -> vector<4x34xf32>
    %94 = vector.broadcast %89 : vector<4x1xf32> to vector<4x34xf32>
    %95 = arith.addf %93, %94 : vector<4x34xf32>
    %cst_76 = arith.constant 0.000000e+00 : f32
    %96 = vector.broadcast %cst_76 : f32 to vector<4x34xf32>
    %97 = arith.maximumf %95, %96 : vector<4x34xf32>
    %cst_77 = arith.constant 0.000000e+00 : f32
    %98 = vector.shape_cast %14 : vector<1x34xi1> to vector<1x34xi1>
    %99 = vector.broadcast %98 : vector<1x34xi1> to vector<4x34xi1>
    %100 = vector.broadcast %cst_77 : f32 to vector<4x34xf32>
    %101 = arith.select %99, %97, %100 : vector<4x34xi1>, vector<4x34xf32>
    %102 = arith.truncf %101 : vector<4x34xf32> to vector<4x34xbf16>
    %c0_78 = arith.constant 0 : index
    %c1_79 = arith.constant 1 : index
    %103 = vector.load %arg6[%c0_78, %c1_79] : memref<4x36xbf16, #tpu.memory_space<vmem>>, vector<4x34xbf16>
    tpu.vector_store %arg6[%c0_78, %c1_79], %102 {strides = array<i32>} : memref<4x36xbf16, #tpu.memory_space<vmem>>, vector<4x34xbf16>,
    %c0_80 = arith.constant 0 : index
    %c0_81 = arith.constant 0 : index
    %104 = vector.load %arg6[%c0_80, %c0_81] : memref<4x36xbf16, #tpu.memory_space<vmem>>, vector<4x34xbf16>
    %c0_82 = arith.constant 0 : index
    %c1_83 = arith.constant 1 : index
    %105 = vector.load %arg6[%c0_82, %c1_83] : memref<4x36xbf16, #tpu.memory_space<vmem>>, vector<4x34xbf16>
    %c0_84 = arith.constant 0 : index
    %c2_85 = arith.constant 2 : index
    %106 = vector.load %arg6[%c0_84, %c2_85] : memref<4x36xbf16, #tpu.memory_space<vmem>>, vector<4x34xbf16>
    %107 = tpu.concatenate %104, %105, %106 in 0 : vector<4x34xbf16>, vector<4x34xbf16>, vector<4x34xbf16> -> vector<12x34xbf16>
    %cst_86 = arith.constant dense<0.000000e+00> : vector<4x34xf32>
    %108 = tpu.matmul %90, %107, %cst_86 {dimension_numbers = #tpu.dot_dimension_numbers<[1], [0], [0], [1], [0, 0, 1, 1], [], []>} : vector<4x12xbf16>, vector<12x34xbf16>, vector<4x34xf32> -> vector<4x34xf32>
    %109 = vector.broadcast %91 : vector<4x1xf32> to vector<4x34xf32>
    %110 = arith.addf %108, %109 : vector<4x34xf32>
    %cst_87 = arith.constant 0.000000e+00 : f32
    %111 = vector.broadcast %cst_87 : f32 to vector<4x34xf32>
    %112 = arith.maximumf %110, %111 : vector<4x34xf32>
    %cst_88 = arith.constant 0.000000e+00 : f32
    %113 = vector.shape_cast %14 : vector<1x34xi1> to vector<1x34xi1>
    %114 = vector.broadcast %113 : vector<1x34xi1> to vector<4x34xi1>
    %115 = vector.broadcast %cst_88 : f32 to vector<4x34xf32>
    %116 = arith.select %114, %112, %115 : vector<4x34xi1>, vector<4x34xf32>
    %c0_89 = arith.constant 0 : index
    %c8_90 = arith.constant 8 : index
    %c1_91 = arith.constant 1 : index
    %117 = vector.load %arg4[%c0_89, %c8_90, %c1_91] : memref<1x20x36xf32, #tpu.memory_space<vmem>>, vector<1x4x34xf32>
    %118 = vector.shape_cast %117 : vector<1x4x34xf32> to vector<4x34xf32>
    %119 = vector.shape_cast %116 : vector<4x34xf32> to vector<1x4x34xf32>
    tpu.vector_store %arg4[%c0_89, %c8_90, %c1_91], %119 {strides = array<i32>} : memref<1x20x36xf32, #tpu.memory_space<vmem>>, vector<1x4x34xf32>,
    %c0_92 = arith.constant 0 : index
    %c8_93 = arith.constant 8 : index
    %c0_94 = arith.constant 0 : index
    %120 = vector.load %arg4[%c0_92, %c8_93, %c0_94] : memref<1x20x36xf32, #tpu.memory_space<vmem>>, vector<1x4x34xf32>
    %121 = vector.shape_cast %120 : vector<1x4x34xf32> to vector<4x34xf32>
    %122 = arith.truncf %121 : vector<4x34xf32> to vector<4x34xbf16>
    %c24_95 = arith.constant 24 : index
    %c0_96 = arith.constant 0 : index
    %123 = vector.load %arg5[%c24_95, %c0_96] : memref<48x34xbf16, #tpu.memory_space<vmem>>, vector<4x34xbf16>
    tpu.vector_store %arg5[%c24_95, %c0_96], %122 {strides = array<i32>} : memref<48x34xbf16, #tpu.memory_space<vmem>>, vector<4x34xbf16>,
    %c0_97 = arith.constant 0 : index
    %c8_98 = arith.constant 8 : index
    %c1_99 = arith.constant 1 : index
    %124 = vector.load %arg4[%c0_97, %c8_98, %c1_99] : memref<1x20x36xf32, #tpu.memory_space<vmem>>, vector<1x4x34xf32>
    %125 = vector.shape_cast %124 : vector<1x4x34xf32> to vector<4x34xf32>
    %126 = arith.truncf %125 : vector<4x34xf32> to vector<4x34xbf16>
    %c28 = arith.constant 28 : index
    %c0_100 = arith.constant 0 : index
    %127 = vector.load %arg5[%c28, %c0_100] : memref<48x34xbf16, #tpu.memory_space<vmem>>, vector<4x34xbf16>
    tpu.vector_store %arg5[%c28, %c0_100], %126 {strides = array<i32>} : memref<48x34xbf16, #tpu.memory_space<vmem>>, vector<4x34xbf16>,
    %c0_101 = arith.constant 0 : index
    %c8_102 = arith.constant 8 : index
    %c2_103 = arith.constant 2 : index
    %128 = vector.load %arg4[%c0_101, %c8_102, %c2_103] : memref<1x20x36xf32, #tpu.memory_space<vmem>>, vector<1x4x34xf32>
    %129 = vector.shape_cast %128 : vector<1x4x34xf32> to vector<4x34xf32>
    %130 = arith.truncf %129 : vector<4x34xf32> to vector<4x34xbf16>
    %c32 = arith.constant 32 : index
    %c0_104 = arith.constant 0 : index
    %131 = vector.load %arg5[%c32, %c0_104] : memref<48x34xbf16, #tpu.memory_space<vmem>>, vector<4x34xbf16>
    tpu.vector_store %arg5[%c32, %c0_104], %130 {strides = array<i32>} : memref<48x34xbf16, #tpu.memory_space<vmem>>, vector<4x34xbf16>,
    %c0_105 = arith.constant 0 : index
    %c60 = arith.constant 60 : index
    %132 = vector.load %arg2[%c0_105, %c60] : memref<4x168xbf16, #tpu.memory_space<vmem>>, vector<4x36xbf16>
    %c0_106 = arith.constant 0 : index
    %c4_107 = arith.constant 4 : index
    %133 = vector.load %arg3[%c0_106, %c4_107] : memref<4x8xf32, #tpu.memory_space<vmem>>, vector<4x1xf32>
    %c0_108 = arith.constant 0 : index
    %c96 = arith.constant 96 : index
    %134 = vector.load %arg2[%c0_108, %c96] : memref<4x168xbf16, #tpu.memory_space<vmem>>, vector<4x12xbf16>
    %c0_109 = arith.constant 0 : index
    %c5 = arith.constant 5 : index
    %135 = vector.load %arg3[%c0_109, %c5] : memref<4x8xf32, #tpu.memory_space<vmem>>, vector<4x1xf32>
    %c0_110 = arith.constant 0 : index
    %c0_111 = arith.constant 0 : index
    %136 = vector.load %arg5[%c0_110, %c0_111] : memref<48x34xbf16, #tpu.memory_space<vmem>>, vector<36x34xbf16>
    %cst_112 = arith.constant dense<0.000000e+00> : vector<4x34xf32>
    %137 = tpu.matmul %132, %136, %cst_112 {dimension_numbers = #tpu.dot_dimension_numbers<[1], [0], [0], [1], [0, 0, 1, 1], [], []>} : vector<4x36xbf16>, vector<36x34xbf16>, vector<4x34xf32> -> vector<4x34xf32>
    %138 = vector.broadcast %133 : vector<4x1xf32> to vector<4x34xf32>
    %139 = arith.addf %137, %138 : vector<4x34xf32>
    %cst_113 = arith.constant 0.000000e+00 : f32
    %140 = vector.broadcast %cst_113 : f32 to vector<4x34xf32>
    %141 = arith.maximumf %139, %140 : vector<4x34xf32>
    %cst_114 = arith.constant 0.000000e+00 : f32
    %142 = vector.shape_cast %14 : vector<1x34xi1> to vector<1x34xi1>
    %143 = vector.broadcast %142 : vector<1x34xi1> to vector<4x34xi1>
    %144 = vector.broadcast %cst_114 : f32 to vector<4x34xf32>
    %145 = arith.select %143, %141, %144 : vector<4x34xi1>, vector<4x34xf32>
    %146 = arith.truncf %145 : vector<4x34xf32> to vector<4x34xbf16>
    %c0_115 = arith.constant 0 : index
    %c1_116 = arith.constant 1 : index
    %147 = vector.load %arg6[%c0_115, %c1_116] : memref<4x36xbf16, #tpu.memory_space<vmem>>, vector<4x34xbf16>
    tpu.vector_store %arg6[%c0_115, %c1_116], %146 {strides = array<i32>} : memref<4x36xbf16, #tpu.memory_space<vmem>>, vector<4x34xbf16>,
    %c0_117 = arith.constant 0 : index
    %c0_118 = arith.constant 0 : index
    %148 = vector.load %arg6[%c0_117, %c0_118] : memref<4x36xbf16, #tpu.memory_space<vmem>>, vector<4x34xbf16>
    %c0_119 = arith.constant 0 : index
    %c1_120 = arith.constant 1 : index
    %149 = vector.load %arg6[%c0_119, %c1_120] : memref<4x36xbf16, #tpu.memory_space<vmem>>, vector<4x34xbf16>
    %c0_121 = arith.constant 0 : index
    %c2_122 = arith.constant 2 : index
    %150 = vector.load %arg6[%c0_121, %c2_122] : memref<4x36xbf16, #tpu.memory_space<vmem>>, vector<4x34xbf16>
    %151 = tpu.concatenate %148, %149, %150 in 0 : vector<4x34xbf16>, vector<4x34xbf16>, vector<4x34xbf16> -> vector<12x34xbf16>
    %cst_123 = arith.constant dense<0.000000e+00> : vector<4x34xf32>
    %152 = tpu.matmul %134, %151, %cst_123 {dimension_numbers = #tpu.dot_dimension_numbers<[1], [0], [0], [1], [0, 0, 1, 1], [], []>} : vector<4x12xbf16>, vector<12x34xbf16>, vector<4x34xf32> -> vector<4x34xf32>
    %153 = vector.broadcast %135 : vector<4x1xf32> to vector<4x34xf32>
    %154 = arith.addf %152, %153 : vector<4x34xf32>
    %cst_124 = arith.constant 0.000000e+00 : f32
    %155 = vector.broadcast %cst_124 : f32 to vector<4x34xf32>
    %156 = arith.maximumf %154, %155 : vector<4x34xf32>
    %cst_125 = arith.constant 0.000000e+00 : f32
    %157 = vector.shape_cast %14 : vector<1x34xi1> to vector<1x34xi1>
    %158 = vector.broadcast %157 : vector<1x34xi1> to vector<4x34xi1>
    %159 = vector.broadcast %cst_125 : f32 to vector<4x34xf32>
    %160 = arith.select %158, %156, %159 : vector<4x34xi1>, vector<4x34xf32>
    %c0_126 = arith.constant 0 : index
    %c12_127 = arith.constant 12 : index
    %c1_128 = arith.constant 1 : index
    %161 = vector.load %arg4[%c0_126, %c12_127, %c1_128] : memref<1x20x36xf32, #tpu.memory_space<vmem>>, vector<1x4x34xf32>
    %162 = vector.shape_cast %161 : vector<1x4x34xf32> to vector<4x34xf32>
    %163 = vector.shape_cast %160 : vector<4x34xf32> to vector<1x4x34xf32>
    tpu.vector_store %arg4[%c0_126, %c12_127, %c1_128], %163 {strides = array<i32>} : memref<1x20x36xf32, #tpu.memory_space<vmem>>, vector<1x4x34xf32>,
    %c0_129 = arith.constant 0 : index
    %c12_130 = arith.constant 12 : index
    %c0_131 = arith.constant 0 : index
    %164 = vector.load %arg4[%c0_129, %c12_130, %c0_131] : memref<1x20x36xf32, #tpu.memory_space<vmem>>, vector<1x4x34xf32>
    %165 = vector.shape_cast %164 : vector<1x4x34xf32> to vector<4x34xf32>
    %166 = arith.truncf %165 : vector<4x34xf32> to vector<4x34xbf16>
    %c36 = arith.constant 36 : index
    %c0_132 = arith.constant 0 : index
    %167 = vector.load %arg5[%c36, %c0_132] : memref<48x34xbf16, #tpu.memory_space<vmem>>, vector<4x34xbf16>
    tpu.vector_store %arg5[%c36, %c0_132], %166 {strides = array<i32>} : memref<48x34xbf16, #tpu.memory_space<vmem>>, vector<4x34xbf16>,
    %c0_133 = arith.constant 0 : index
    %c12_134 = arith.constant 12 : index
    %c1_135 = arith.constant 1 : index
    %168 = vector.load %arg4[%c0_133, %c12_134, %c1_135] : memref<1x20x36xf32, #tpu.memory_space<vmem>>, vector<1x4x34xf32>
    %169 = vector.shape_cast %168 : vector<1x4x34xf32> to vector<4x34xf32>
    %170 = arith.truncf %169 : vector<4x34xf32> to vector<4x34xbf16>
    %c40 = arith.constant 40 : index
    %c0_136 = arith.constant 0 : index
    %171 = vector.load %arg5[%c40, %c0_136] : memref<48x34xbf16, #tpu.memory_space<vmem>>, vector<4x34xbf16>
    tpu.vector_store %arg5[%c40, %c0_136], %170 {strides = array<i32>} : memref<48x34xbf16, #tpu.memory_space<vmem>>, vector<4x34xbf16>,
    %c0_137 = arith.constant 0 : index
    %c12_138 = arith.constant 12 : index
    %c2_139 = arith.constant 2 : index
    %172 = vector.load %arg4[%c0_137, %c12_138, %c2_139] : memref<1x20x36xf32, #tpu.memory_space<vmem>>, vector<1x4x34xf32>
    %173 = vector.shape_cast %172 : vector<1x4x34xf32> to vector<4x34xf32>
    %174 = arith.truncf %173 : vector<4x34xf32> to vector<4x34xbf16>
    %c44 = arith.constant 44 : index
    %c0_140 = arith.constant 0 : index
    %175 = vector.load %arg5[%c44, %c0_140] : memref<48x34xbf16, #tpu.memory_space<vmem>>, vector<4x34xbf16>
    tpu.vector_store %arg5[%c44, %c0_140], %174 {strides = array<i32>} : memref<48x34xbf16, #tpu.memory_space<vmem>>, vector<4x34xbf16>,
    %c0_141 = arith.constant 0 : index
    %c108 = arith.constant 108 : index
    %176 = vector.load %arg2[%c0_141, %c108] : memref<4x168xbf16, #tpu.memory_space<vmem>>, vector<4x48xbf16>
    %c0_142 = arith.constant 0 : index
    %c6 = arith.constant 6 : index
    %177 = vector.load %arg3[%c0_142, %c6] : memref<4x8xf32, #tpu.memory_space<vmem>>, vector<4x1xf32>
    %c0_143 = arith.constant 0 : index
    %c156 = arith.constant 156 : index
    %178 = vector.load %arg2[%c0_143, %c156] : memref<4x168xbf16, #tpu.memory_space<vmem>>, vector<4x12xbf16>
    %c0_144 = arith.constant 0 : index
    %c7 = arith.constant 7 : index
    %179 = vector.load %arg3[%c0_144, %c7] : memref<4x8xf32, #tpu.memory_space<vmem>>, vector<4x1xf32>
    %c0_145 = arith.constant 0 : index
    %c0_146 = arith.constant 0 : index
    %180 = vector.load %arg5[%c0_145, %c0_146] : memref<48x34xbf16, #tpu.memory_space<vmem>>, vector<48x34xbf16>
    %cst_147 = arith.constant dense<0.000000e+00> : vector<4x34xf32>
    %181 = tpu.matmul %176, %180, %cst_147 {dimension_numbers = #tpu.dot_dimension_numbers<[1], [0], [0], [1], [0, 0, 1, 1], [], []>} : vector<4x48xbf16>, vector<48x34xbf16>, vector<4x34xf32> -> vector<4x34xf32>
    %182 = vector.broadcast %177 : vector<4x1xf32> to vector<4x34xf32>
    %183 = arith.addf %181, %182 : vector<4x34xf32>
    %cst_148 = arith.constant 0.000000e+00 : f32
    %184 = vector.broadcast %cst_148 : f32 to vector<4x34xf32>
    %185 = arith.maximumf %183, %184 : vector<4x34xf32>
    %cst_149 = arith.constant 0.000000e+00 : f32
    %186 = vector.shape_cast %14 : vector<1x34xi1> to vector<1x34xi1>
    %187 = vector.broadcast %186 : vector<1x34xi1> to vector<4x34xi1>
    %188 = vector.broadcast %cst_149 : f32 to vector<4x34xf32>
    %189 = arith.select %187, %185, %188 : vector<4x34xi1>, vector<4x34xf32>
    %190 = arith.truncf %189 : vector<4x34xf32> to vector<4x34xbf16>
    %c0_150 = arith.constant 0 : index
    %c1_151 = arith.constant 1 : index
    %191 = vector.load %arg6[%c0_150, %c1_151] : memref<4x36xbf16, #tpu.memory_space<vmem>>, vector<4x34xbf16>
    tpu.vector_store %arg6[%c0_150, %c1_151], %190 {strides = array<i32>} : memref<4x36xbf16, #tpu.memory_space<vmem>>, vector<4x34xbf16>,
    %c0_152 = arith.constant 0 : index
    %c0_153 = arith.constant 0 : index
    %192 = vector.load %arg6[%c0_152, %c0_153] : memref<4x36xbf16, #tpu.memory_space<vmem>>, vector<4x34xbf16>
    %c0_154 = arith.constant 0 : index
    %c1_155 = arith.constant 1 : index
    %193 = vector.load %arg6[%c0_154, %c1_155] : memref<4x36xbf16, #tpu.memory_space<vmem>>, vector<4x34xbf16>
    %c0_156 = arith.constant 0 : index
    %c2_157 = arith.constant 2 : index
    %194 = vector.load %arg6[%c0_156, %c2_157] : memref<4x36xbf16, #tpu.memory_space<vmem>>, vector<4x34xbf16>
    %195 = tpu.concatenate %192, %193, %194 in 0 : vector<4x34xbf16>, vector<4x34xbf16>, vector<4x34xbf16> -> vector<12x34xbf16>
    %cst_158 = arith.constant dense<0.000000e+00> : vector<4x34xf32>
    %196 = tpu.matmul %178, %195, %cst_158 {dimension_numbers = #tpu.dot_dimension_numbers<[1], [0], [0], [1], [0, 0, 1, 1], [], []>} : vector<4x12xbf16>, vector<12x34xbf16>, vector<4x34xf32> -> vector<4x34xf32>
    %197 = vector.broadcast %179 : vector<4x1xf32> to vector<4x34xf32>
    %198 = arith.addf %196, %197 : vector<4x34xf32>
    %cst_159 = arith.constant 0.000000e+00 : f32
    %199 = vector.broadcast %cst_159 : f32 to vector<4x34xf32>
    %200 = arith.maximumf %198, %199 : vector<4x34xf32>
    %cst_160 = arith.constant 0.000000e+00 : f32
    %201 = vector.shape_cast %14 : vector<1x34xi1> to vector<1x34xi1>
    %202 = vector.broadcast %201 : vector<1x34xi1> to vector<4x34xi1>
    %203 = vector.broadcast %cst_160 : f32 to vector<4x34xf32>
    %204 = arith.select %202, %200, %203 : vector<4x34xi1>, vector<4x34xf32>
    %c0_161 = arith.constant 0 : index
    %c16_162 = arith.constant 16 : index
    %c1_163 = arith.constant 1 : index
    %205 = vector.load %arg4[%c0_161, %c16_162, %c1_163] : memref<1x20x36xf32, #tpu.memory_space<vmem>>, vector<1x4x34xf32>
    %206 = vector.shape_cast %205 : vector<1x4x34xf32> to vector<4x34xf32>
    %207 = vector.shape_cast %204 : vector<4x34xf32> to vector<1x4x34xf32>
    tpu.vector_store %arg4[%c0_161, %c16_162, %c1_163], %207 {strides = array<i32>} : memref<1x20x36xf32, #tpu.memory_space<vmem>>, vector<1x4x34xf32>,
    return
  }
  func.func @transform_0(%arg0: i32) -> (i32, i32, i32) {
    %c0_i32 = arith.constant 0 : i32
    %c0_i32_0 = arith.constant 0 : i32
    %c0_i32_1 = arith.constant 0 : i32
    return %arg0, %c0_i32, %c0_i32_0 : i32, i32, i32
  }
  func.func @transform_1(%arg0: i32) -> (i32, i32) {
    %c0_i32 = arith.constant 0 : i32
    %c0_i32_0 = arith.constant 0 : i32
    %c0_i32_1 = arith.constant 0 : i32
    return %c0_i32, %c0_i32_0 : i32, i32
  }
  func.func @transform_2(%arg0: i32) -> (i32, i32) {
    %c0_i32 = arith.constant 0 : i32
    %c0_i32_0 = arith.constant 0 : i32
    %c0_i32_1 = arith.constant 0 : i32
    return %c0_i32, %c0_i32_0 : i32, i32
  }
  func.func @transform_3(%arg0: i32) -> (i32, i32, i32) {
    %c0_i32 = arith.constant 0 : i32
    %c0_i32_0 = arith.constant 0 : i32
    %c0_i32_1 = arith.constant 0 : i32
    return %arg0, %c0_i32, %c0_i32_0 : i32, i32, i32
  }
}

</mosaic_0001>

<bundles_post_ra>
// kernel: tpu_custom_call.1
= control target key start
LH: loop header
LB: loop body
LE: loop exit
PB: predicated region body
PF: predicated region fallthrough
CT: control target
= control target key end

     0   :  { %8 = vsyncpa [#allocation5], 0  ;;  %s1389_s0 = inlined_call_operand.hbm [shape: f32[1,4,36], index: 0, kind: input, shape index: {}]   ;;  %s1390_s1 = inlined_call_operand.hbm [shape: bf16[4,168], index: 1, kind: input, shape index: {}]   ;;  %s1391_s2 = inlined_call_operand.hbm [shape: f32[4,8], index: 2, kind: input, shape index: {}]   ;;  %s1392_s3 = inlined_call_operand.vmem [shape: f32[1,20,36], index: 3, kind: output, shape index: {}]  }
   0x1   :  { %9 = vsyncpa [#allocation7], 0  ;;  %s1144_s12 = smov [#allocation6]   ;;  %s1145_s14 = smov [#allocation4]  }
   0x2   :  { %s26_s13 = sshll.u32 %s1144_s12, 4  ;;  %s16_s15 = sshll.u32 %s1145_s14, 4  ;;  %s27_s13 = int_to_ptr.vmem [resolvable:$true] %s26_s13  ;;  %s17_s15 = int_to_ptr.vmem [resolvable:$true] %s16_s15 }
   0x3   :  { %s1088_s16 = scalar_lea.vmem %s27_s13, 64  ;;  %p1093_p1 = scmp.lt.s32.totalorder %s27_s13, %s27_s13 }
   0x4   :  { %p1089_p0 = scmp.ne.s32.totalorder %s27_s13, %s1088_s16  ;;  %p1094_p2 = scmp.lt.s32.totalorder %s1088_s16, %s1088_s16 }
   0x6   :  { %p1095_p3 = por %p1094_p2, %p1093_p1 }
   0x8   :  { %p1096_p4 = pnand %p1095_p3, %p1089_p0 }
   0xa   :  { %1099 = shalt.err (!%p1096_p4)
}
   0xb   :  { %29 = dma.hbm_to_vmem [thread:$0]  %s1390_s1, 64, %s27_s13, [#allocation7]  }
   0xc   :  { %s1108_s19 = scalar_lea.vmem %s17_s15, 64  ;;  %p1113_p6 = scmp.lt.s32.totalorder %s17_s15, %s17_s15 }
   0xd   :  { %p1109_p5 = scmp.ne.s32.totalorder %s17_s15, %s1108_s19  ;;  %p1114_p7 = scmp.lt.s32.totalorder %s1108_s19, %s1108_s19 }
   0xf   :  { %p1115_p8 = por %p1114_p7, %p1113_p6 }
  0x11   :  { %p1116_p9 = pnand %p1115_p8, %p1109_p5 }
  0x13   :  { %1119 = shalt.err (!%p1116_p9)
}
  0x14   :  { %19 = dma.hbm_to_vmem [thread:$0]  %s1389_s0, 64, %s17_s15, [#allocation5]  }
  0x15   :  { %s1146_s22 = smov [#allocation8]  }
  0x16   :  { %s36_s23 = sshll.u32 %s1146_s22, 4  ;;  %s37_s23 = int_to_ptr.vmem [resolvable:$true] %s36_s23 }
  0x17   :  { %s1128_s24 = scalar_lea.vmem %s37_s23, 64  ;;  %p1133_p11 = scmp.lt.s32.totalorder %s37_s23, %s37_s23 }
  0x18   :  { %p1129_p10 = scmp.ne.s32.totalorder %s37_s23, %s1128_s24  ;;  %p1134_p12 = scmp.lt.s32.totalorder %s1128_s24, %s1128_s24 }
  0x1a   :  { %p1135_p13 = por %p1134_p12, %p1133_p11 }
  0x1c   :  { %p1136_p0 = pnand %p1135_p13, %p1129_p10 }
  0x1e   :  { %1139 = shalt.err (!%p1136_p0)
}
  0x1f   :  { %39 = dma.hbm_to_vmem [thread:$0]  %s1391_s2, 64, %s37_s23, [#allocation7]  }
  0x20   :  { %1140 = dma.done.wait [#allocation5], 64  }
  0x21   :  { %1141 = vsyncadd [#allocation5], 4294967232 }
  0x22   :  { %1142 = dma.done.wait [#allocation7], 128  }
  0x23   :  { %1143 = vsyncadd [#allocation7], 4294967168  ;;  %v1147_v0 = vmov 0.0   ;;  %vm72_vm0 = vcmask 289792   ;;  %v71_v1 = vld [vmem:[#allocation4] sm:$0xf]  ;;  %v50_v16 = vlaneseq }
  0x24   :  { %977 = vmatprep.subr.bf16.mxu0 %v1147_v0  ;;  %983 = vmatprep.subr.bf16.mxu1 %v1147_v0  ;;  %v78_v2 = vld [vmem:[#allocation4] sm:$0xf]  ;;  %73 = vst.msk [vmem:[%s1392_s3] sm:$0xf] %vm72_vm0, %v71_v1  ;;  %vm76_vm1 = vcmask 271360   ;;  %s1148_s2 = smov 127  }
  0x25   :  { %v946_v3 = vpack.c.bf16 %v78_v2, %v78_v2  ;;  %v74_v4 = vld [vmem:[#allocation4] sm:$0xf]  ;;  %vm1149_vm2 = vmmov 0   ;;  %s1150_s27 = smov 126   ;;  %vm69_vm3 = vcmask 288024   ;;  %vm67_vm4 = vcmask 1024  }
  0x26   :  { %v89_v5 = vld [vmem:[#allocation4] sm:$0xf]  ;;  %v75_v6 = vpack.c.bf16 %v74_v4, %v74_v4  ;;  %979 = vmatprep.mubr.msk.bf16.mxu0 %vm1149_vm2, %v1147_v0  ;;  %985 = vmatprep.mubr.msk.bf16.mxu1 %vm1149_vm2, %v1147_v0  ;;  %v99_v9 = vld [vmem:[#allocation8] sm:$0xf]  ;;  %v1151_v10 = vmov 0   ;;  %vm87_vm5 = vcmask 273410  }
  0x27   :  { %v83_v7 = vrot.slane %v946_v3, 6  ;;  %v947_v8 = vpack.c.bf16 %v89_v5, %v89_v5  ;;  %1059 = vset.pattern.permute.xlu1 %v1151_v10  ;;  %68 = vst.msk [vmem:[#allocation3] sm:$0x3] %vm67_vm4, %v1151_v10  ;;  %vm116_vm6 = vcmask 1045504   ;;  %v98_v15 = vld [vmem:[#allocation6] sm:$0x3] }
  0x28   :  { %77 = vst.msk [vmem:[#allocation2] sm:$0x3] %vm76_vm1, %v75_v6  ;;  %104 = vperm.xlu1 %1059, %v99_v9   ;;  %vm112_vm7 = vcmask 97280   ;;  %v51_v17 = vand.u32 127, %v50_v16  ;;  %v1152_v18 = vmov 1983009808  }
  0x29   :  { %84 = vrot.lane.b32.xlu0 %v83_v7, %s1148_s2  ;;  %70 = vst.msk [vmem:[#allocation3] sm:$0x3] %vm69_vm3, %v1151_v10  ;;  %v167_v19 = vunpack.c.l.s4 %v1152_v18  ;;  %v170_v23 = vshrl.u32 %v50_v16, 7  ;;  %s1153_s28 = smov 1   ;;  %vm176_vm13 = vcmask 279560   ;;  %v1154_v35 = vmov 1  }
  0x2a   :  { %vm57_vm8 = vcmp.ge.s32.totalorder %v51_v17, 18  ;;  %vm58_vm9 = vcmp.lt.s32.totalorder %v51_v17, 34  ;;  %vm54_vm10 = vcmp.lt.s32.totalorder %v51_v17, 16  ;;  %s1155_s29 = smov 116   ;;  %vm200_vm14 = vcmask 1041408   ;;  %s1156_s19 = smov 104  }
  0x2b   :  { %vm59_vm11 = vmand %vm57_vm8, %vm58_vm9  ;;  %v168_v22 = vunpack.c.0.s8 %v167_v19  ;;  %vm204_vm15 = vcmask 1043456   ;;  %vm61_vm0 = vcmask 7168   ;;  %vm64_vm3 = vcmask 294168   ;;  %v302_v3 = vld [vmem:[#allocation8] sm:$0xf]  ;;  %s1159_s20 = smov 80  }
  0x2c   :  { %vm1216_vm12 = vmor %vm54_vm10, %vm59_vm11  ;;  %1060 = vset.pattern.permute.xlu1 %v1154_v35  ;;  %62 = vst.msk [vmem:[%s1392_s3 + $0x4] sm:$0xff] %vm61_vm0, %v1147_v0  ;;  %vm272_vm4 = vcmask 281608   ;;  %v1272_v2 = vld.sshfl [vmem:[#allocation6] sm:$0x3 pattern:$0x76325410] }
  0x2d   :  { %94 = vrot.lane.b32.xlu0 %v947_v8, %s1150_s27  ;;  %v1220_v28 = vsub.s32 %v168_v22, %v170_v23  ;;  %63 = vst.msk [vmem:[%s1392_s3 + $0xc] sm:$0xff] %vm61_vm0, %v1147_v0  ;;  %v1157_v4 = vmov 2   ;;  %vm330_vm8 = vcmask 195584   ;;  %v1158_v22 = vmov 3   ;;  %s1163_s30 = smov 32   ;;  %s1164_s12 = smov 20  }
  0x2e   :  { %65 = vst.msk [vmem:[%s1392_s3 + $0x4] sm:$0xff] %vm64_vm3, %v1147_v0  ;;  %66 = vst.msk [vmem:[%s1392_s3 + $0xc] sm:$0xff] %vm64_vm3, %v1147_v0  ;;  %1061 = vset.pattern.permute.xlu0 %v1157_v4  ;;  %vm536_vm9 = vcmask 293888   ;;  %vm757_vm10 = vcmask 392192   ;;  %s1167_s13 = smov 100  }
  0x2f   :  { %v218_v41 = vrot.slane %v98_v15, %v1220_v28 }
  0x9b   :  { %v85_v11 = vpop.permute.xlu0 %84 }
  0x9c   :  { %88 = vst.msk [vmem:[#allocation2] sm:$0xc] %vm87_vm5, %v85_v11 }
  0x9f   :  { %v95_v12 = vpop.permute.xlu0 %94 }
  0xa0   :  { %97 = vst.msk [vmem:[#allocation2 + $0x4] sm:$0x3] %vm76_vm1, %v95_v12 }
  0xa3   :  { %v105_v20 = vpop.permute.xlu1 %104 }
  0xa7   :  { %v1067_v13 = vld [vmem:[#allocation2] sm:$0x3f]  }
  0xa8   :  { %v118_v14 = vsel %vm116_vm6, %v1067_v13, 0 }
  0xa9   :  { %978 = vmatpush3.bf16.msra.mxu0 %v118_v14 }
  0xaa   :  { %989 = vmatprep.subr.bf16.mxu0 %v1147_v0 }
  0xac   :  { %980 = vmatmul.mubr.msk.bf16.vlgmr.msra.gmra.mxu0 %vm112_vm7, %v98_v15 }
  0xad   :  { %993 = vmatprep.mubr.msk.bf16.mxu0 %vm1149_vm2, %v1147_v0 }
 0x16c   :  { %v154_v21 = vpop.f32.mrf.mxu0 }
 0x16d   :  { %v155_v24 = vadd.f32 %v154_v21, %v105_v20 }
 0x16e   :  { %v981_v26 = vpop.f32.mrf.mxu0 }
 0x16f   :  { %v160_v27 = vmax.f32 %v155_v24, 0.0 }
 0x170   :  { %v157_v29 = vpop.f32.mrf.mxu0 }
 0x171   :  { %v163_v30 = vsel %vm1216_vm12, %v160_v27, 0.0 }
 0x172   :  { %v164_v31 = vpack.c.bf16 %v163_v30, %v163_v30  ;;  %v982_v32 = vpop.f32.mrf.mxu0 }
 0x174   :  { %v172_v33 = vrot.slane %v164_v31, %v1220_v28 }
 0x176   :  { %173 = vrot.lane.b32.xlu1 %v172_v33, %s1153_s28 }
 0x1e8   :  { %v174_v34 = vpop.permute.xlu1 %173 }
 0x1e9   :  { %177 = vst.msk [vmem:[#allocation3] sm:$0x3] %vm176_vm13, %v174_v34 }
 0x1f0   :  { %v178_v36 = vld [vmem:[#allocation3] sm:$0x3] }
 0x1f1   :  { %v194_v37 = vrot.slane %v178_v36, %v1220_v28  ;;  %v180_v38 = vcombine.low %v178_v36, %v178_v36 }
 0x1f3   :  { %v197_v39 = vcombine.low %v194_v37, %v194_v37  ;;  %v187_v40 = vrot.slane %v180_v38, %v1220_v28 }
 0x1f5   :  { %198 = vrot.lane.b32.xlu1 %v197_v39, %s1150_s27  ;;  %195 = vrot.lane.b32.xlu0 %v187_v40, %s1148_s2 }
 0x1f9   :  { %219 = vrot.lane.b32.xlu0 %v218_v41, %s1155_s29  ;;  %208 = vperm.xlu1 %1060, %v99_v9   ;;  %s1160_s29 = smov 68  }
 0x267   :  { %v199_v42 = vpop.permute.xlu1 %198  ;;  %v196_v43 = vpop.permute.xlu0 %195 }
 0x268   :  { %v203_v44 = vsel %vm200_vm14, %v178_v36, %v196_v43 }
 0x269   :  { %v206_v45 = vsel %vm204_vm15, %v203_v44, %v199_v42 }
 0x26a   :  { %v224_v46 = vsel %vm116_vm6, %v206_v45, 0 }
 0x26b   :  { %984 = vmatpush3.bf16.msra.mxu1 %v224_v46  ;;  %v220_v47 = vpop.permute.xlu0 %219 }
 0x26c   :  { %997 = vmatprep.subr.bf16.mxu1 %v1147_v0 }
 0x26e   :  { %986 = vmatmul.mubr.msk.bf16.vlgmr.msra.gmra.mxu1 %vm112_vm7, %v220_v47 }
 0x26f   :  { %999 = vmatprep.mubr.msk.bf16.mxu1 %vm1149_vm2, %v1147_v0 }
 0x274   :  { %v209_v48 = vpop.permute.xlu1 %208 }
 0x32e   :  { %v260_v49 = vpop.f32.mrf.mxu1 }
 0x32f   :  { %v261_v50 = vadd.f32 %v260_v49, %v209_v48 }
 0x330   :  { %v987_v51 = vpop.f32.mrf.mxu1 }
 0x331   :  { %v266_v52 = vmax.f32 %v261_v50, 0.0 }
 0x332   :  { %v263_v53 = vpop.f32.mrf.mxu1 }
 0x333   :  { %v267_v54 = vsel %vm1216_vm12, %v266_v52, 0.0  ;;  %v500_v52 = vld [vmem:[#allocation8] sm:$0xf]  ;;  %v1161_v53 = vmov 4  }
 0x334   :  { %269 = vrot.lane.b32.xlu0 %v267_v54, %s1153_s28  ;;  %v988_v55 = vpop.f32.mrf.mxu1 }
 0x3a6   :  { %v270_v56 = vpop.permute.xlu0 %269 }
 0x3a7   :  { %273 = vst.msk [vmem:[%s1392_s3 + $0x4] sm:$0xf] %vm272_vm4, %v270_v56 }
 0x3ae   :  { %v274_v57 = vld [vmem:[%s1392_s3 + $0x4] sm:$0xf] }
 0x3af   :  { %v282_v58 = vld [vmem:[%s1392_s3 + $0x4] sm:$0xf]  ;;  %v948_v60 = vpack.c.bf16 %v274_v57, %v274_v57 }
 0x3b0   :  { %v291_v59 = vld [vmem:[%s1392_s3 + $0x4] sm:$0xf]  ;;  %v949_v61 = vpack.c.bf16 %v282_v58, %v282_v58 }
 0x3b1   :  { %v950_v62 = vpack.c.bf16 %v291_v59, %v291_v59  ;;  %v279_v63 = vrot.slane %v948_v60, 6 }
 0x3b2   :  { %287 = vrot.lane.b32.xlu1 %v949_v61, %s1148_s2 }
 0x3b3   :  { %v296_v1 = vrot.slane %v950_v62, 6  ;;  %281 = vst.msk [vmem:[#allocation2 + $0x4] sm:$0xc] %vm87_vm5, %v279_v63 }
 0x3b5   :  { %297 = vrot.lane.b32.xlu0 %v296_v1, %s1150_s27 }
 0x3b6   :  { %319 = vrot.lane.b32.xlu1 %v1272_v2, %s1156_s19 }
 0x3b9   :  { %308 = vperm.xlu0 %1061, %v302_v3  }
 0x3ba   :  { %v1070_v9 = vld [vmem:[#allocation2] sm:$0xff]  }
 0x3bb   :  { %v1074_v59 = vld [vmem:[#allocation2] sm:$0xff]  }
 0x3bd   :  { %1062 = vset.pattern.permute.xlu0 %v1158_v22 }
 0x424   :  { %v288_v5 = vpop.permute.xlu1 %287 }
 0x425   :  { %290 = vst.msk [vmem:[#allocation2 + $0x8] sm:$0x3] %vm76_vm1, %v288_v5 }
 0x427   :  { %v298_v6 = vpop.permute.xlu0 %297 }
 0x428   :  { %300 = vst.msk [vmem:[#allocation2 + $0x8] sm:$0xc] %vm87_vm5, %v298_v6  ;;  %v320_v10 = vpop.permute.xlu1 %319 }
 0x42c   :  { %v1069_v7 = vld [vmem:[#allocation2 + $0x8] ss:$0 sps:$4 sm:$0xff]  }
 0x42d   :  { %v335_v8 = vsel %vm204_vm15, %v1069_v7, 0 }
 0x42e   :  { %990 = vmatpush3.bf16.msra.mxu0 %v335_v8 }
 0x42f   :  { %991 = vmatprep.subr.bf16.mxu0 %v1147_v0 }
 0x432   :  { %992 = vmatpush3.bf16.msra.mxu0 %v1070_v9 }
 0x433   :  { %1003 = vmatprep.subr.bf16.mxu0 %v1147_v0 }
 0x434   :  { %v309_v11 = vpop.permute.xlu0 %308 }
 0x435   :  { %994 = vmatmul.mubr.msk.bf16.vlgmr.msra.gmra.mxu0 %vm330_vm8, %v320_v10  ;;  %v1162_v10 = vmov 5  }
 0x436   :  { %1009 = vmatprep.mubr.msk.bf16.mxu0 %vm1149_vm2, %v1147_v0 }
 0x4f5   :  { %v371_v12 = vpop.f32.mrf.mxu0 }
 0x4f6   :  { %v372_v13 = vadd.f32 %v371_v12, %v309_v11 }
 0x4f7   :  { %v995_v14 = vpop.f32.mrf.mxu0 }
 0x4f8   :  { %v377_v15 = vmax.f32 %v372_v13, 0.0 }
 0x4f9   :  { %v374_v16 = vpop.f32.mrf.mxu0 }
 0x4fa   :  { %v378_v17 = vsel %vm1216_vm12, %v377_v15, 0.0 }
 0x4fb   :  { %v379_v18 = vpack.c.bf16 %v378_v17, %v378_v17  ;;  %v996_v19 = vpop.f32.mrf.mxu0 }
 0x4fd   :  { %v387_v20 = vrot.slane %v379_v18, %v1220_v28 }
 0x4ff   :  { %388 = vrot.lane.b32.xlu1 %v387_v20, %s1153_s28 }
 0x571   :  { %v389_v21 = vpop.permute.xlu1 %388 }
 0x572   :  { %391 = vst.msk [vmem:[#allocation3] sm:$0x3] %vm176_vm13, %v389_v21 }
 0x579   :  { %v392_v23 = vld [vmem:[#allocation3] sm:$0x3] }
 0x57a   :  { %v408_v24 = vrot.slane %v392_v23, %v1220_v28  ;;  %v394_v26 = vcombine.low %v392_v23, %v392_v23 }
 0x57c   :  { %v411_v27 = vcombine.low %v408_v24, %v408_v24  ;;  %v401_v29 = vrot.slane %v394_v26, %v1220_v28 }
 0x57e   :  { %412 = vrot.lane.b32.xlu0 %v411_v27, %s1150_s27  ;;  %409 = vrot.lane.b32.xlu1 %v401_v29, %s1148_s2 }
 0x582   :  { %423 = vrot.lane.b32.xlu1 %v1272_v2, %s1159_s20  ;;  %420 = vperm.xlu0 %1062, %v302_v3  }
 0x586   :  { %1063 = vset.pattern.permute.xlu0 %v1161_v53 }
 0x5f0   :  { %v413_v30 = vpop.permute.xlu0 %412  ;;  %v410_v31 = vpop.permute.xlu1 %409 }
 0x5f1   :  { %v416_v32 = vsel %vm200_vm14, %v392_v23, %v410_v31 }
 0x5f2   :  { %v418_v33 = vsel %vm204_vm15, %v416_v32, %v413_v30 }
 0x5f3   :  { %v428_v34 = vsel %vm116_vm6, %v418_v33, 0 }
 0x5f4   :  { %998 = vmatpush3.bf16.msra.mxu1 %v428_v34  ;;  %v424_v35 = vpop.permute.xlu1 %423 }
 0x5f5   :  { %1013 = vmatprep.subr.bf16.mxu1 %v1147_v0 }
 0x5f7   :  { %1000 = vmatmul.mubr.msk.bf16.vlgmr.msra.gmra.mxu1 %vm112_vm7, %v424_v35 }
 0x5f8   :  { %1015 = vmatprep.mubr.msk.bf16.mxu1 %vm1149_vm2, %v1147_v0 }
 0x5fd   :  { %v421_v36 = vpop.permute.xlu0 %420 }
 0x6b7   :  { %v464_v37 = vpop.f32.mrf.mxu1 }
 0x6b8   :  { %v465_v38 = vadd.f32 %v464_v37, %v421_v36 }
 0x6b9   :  { %v1001_v39 = vpop.f32.mrf.mxu1 }
 0x6ba   :  { %v470_v40 = vmax.f32 %v465_v38, 0.0  ;;  %v939_v38 = vld.sshfl [vmem:[#allocation6] sm:$0x33 pattern:$0x76325410] }
 0x6bb   :  { %v467_v41 = vpop.f32.mrf.mxu1 }
 0x6bc   :  { %v471_v42 = vsel %vm1216_vm12, %v470_v40, 0.0  ;;  %v732_v41 = vcombine.high %v939_v38, %v939_v38 }
 0x6bd   :  { %473 = vrot.lane.b32.xlu1 %v471_v42, %s1153_s28  ;;  %v1002_v43 = vpop.f32.mrf.mxu1  ;;  %v711_v42 = vld [vmem:[#allocation8] sm:$0xf] }
 0x6be   :  { %v1165_v43 = vmov 6  }
 0x6bf   :  { %1065 = vset.pattern.permute.xlu1 %v1165_v43 }
 0x72f   :  { %v474_v44 = vpop.permute.xlu1 %473 }
 0x730   :  { %476 = vst.msk [vmem:[%s1392_s3 + $0x8] sm:$0xf] %vm272_vm4, %v474_v44 }
 0x737   :  { %v477_v45 = vld [vmem:[%s1392_s3 + $0x8] sm:$0xf] }
 0x738   :  { %v490_v46 = vld [vmem:[%s1392_s3 + $0x8] sm:$0xf]  ;;  %v478_v48 = vpack.c.bf16 %v477_v45, %v477_v45 }
 0x739   :  { %v480_v47 = vld [vmem:[%s1392_s3 + $0x8] sm:$0xf]  ;;  %v952_v49 = vpack.c.bf16 %v490_v46, %v490_v46 }
 0x73a   :  { %v951_v50 = vpack.c.bf16 %v480_v47, %v480_v47  ;;  %479 = vst.msk [vmem:[#allocation2 + $0xc] sm:$0x3] %vm76_vm1, %v478_v48 }
 0x73b   :  { %495 = vrot.lane.b32.xlu1 %v952_v49, %s1150_s27 }
 0x73c   :  { %v485_v51 = vrot.slane %v951_v50, 6  ;;  %v1078_v50 = vld [vmem:[#allocation2] sm:$0xff]  }
 0x73e   :  { %486 = vrot.lane.b32.xlu0 %v485_v51, %s1148_s2 }
 0x73f   :  { %519 = vrot.lane.b32.xlu1 %v1272_v2, %s1160_s29 }
 0x742   :  { %508 = vperm.xlu0 %1063, %v500_v52  }
 0x746   :  { %1064 = vset.pattern.permute.xlu0 %v1162_v10 }
 0x7ad   :  { %v496_v54 = vpop.permute.xlu1 %495 }
 0x7ae   :  { %498 = vst.msk [vmem:[#allocation2 + $0x10] sm:$0x3] %vm76_vm1, %v496_v54 }
 0x7b0   :  { %v487_v55 = vpop.permute.xlu0 %486 }
 0x7b1   :  { %489 = vst.msk [vmem:[#allocation2 + $0xc] sm:$0xc] %vm87_vm5, %v487_v55  ;;  %v520_v60 = vpop.permute.xlu1 %519 }
 0x7b5   :  { %v1072_v56 = vld [vmem:[#allocation2 + $0x10] ss:$0 sps:$4 sm:$0x33]  }
 0x7b6   :  { %v541_v57 = vsel %vm200_vm14, %v1072_v56, 0 }
 0x7b7   :  { %1004 = vmatpush3.bf16.msra.mxu0 %v541_v57 }
 0x7b8   :  { %1005 = vmatprep.subr.bf16.mxu0 %v1147_v0  ;;  %v1073_v58 = vld [vmem:[#allocation2 + $0x8] sm:$0xff]  }
 0x7b9   :  { %v1077_v47 = vld [vmem:[#allocation2 + $0x8] sm:$0xff]  }
 0x7bb   :  { %1006 = vmatpush3.bf16.msra.mxu0 %v1073_v58 }
 0x7bc   :  { %1007 = vmatprep.subr.bf16.mxu0 %v1147_v0 }
 0x7bd   :  { %v509_v61 = vpop.permute.xlu0 %508 }
 0x7bf   :  { %1008 = vmatpush3.bf16.msra.mxu0 %v1074_v59 }
 0x7c0   :  { %1029 = vmatprep.subr.bf16.mxu0 %v1147_v0 }
 0x7c2   :  { %1010 = vmatmul.mubr.msk.bf16.vlgmr.msra.gmra.mxu0 %vm536_vm9, %v520_v60 }
 0x7c3   :  { %1031 = vmatprep.mubr.msk.bf16.mxu0 %vm1149_vm2, %v1147_v0 }
 0x882   :  { %v577_v62 = vpop.f32.mrf.mxu0 }
 0x883   :  { %v578_v63 = vadd.f32 %v577_v62, %v509_v61  ;;  %v1166_v62 = vmov 7  }
 0x884   :  { %v1011_v1 = vpop.f32.mrf.mxu0 }
 0x885   :  { %v583_v3 = vmax.f32 %v578_v63, 0.0 }
 0x886   :  { %v580_v4 = vpop.f32.mrf.mxu0 }
 0x887   :  { %v584_v5 = vsel %vm1216_vm12, %v583_v3, 0.0 }
 0x888   :  { %v585_v6 = vpack.c.bf16 %v584_v5, %v584_v5  ;;  %v1012_v7 = vpop.f32.mrf.mxu0 }
 0x88a   :  { %v593_v8 = vrot.slane %v585_v6, %v1220_v28  ;;  %v944_v6 = vld.sshfl [vmem:[#allocation6 + $0x2] sm:$0x3 pattern:$0x76325410] }
 0x88c   :  { %594 = vrot.lane.b32.xlu1 %v593_v8, %s1153_s28 }
 0x8fe   :  { %v595_v9 = vpop.permute.xlu1 %594 }
 0x8ff   :  { %597 = vst.msk [vmem:[#allocation3] sm:$0x3] %vm176_vm13, %v595_v9 }
 0x906   :  { %v598_v11 = vld [vmem:[#allocation3] sm:$0x3] }
 0x907   :  { %v614_v12 = vrot.slane %v598_v11, %v1220_v28  ;;  %v600_v13 = vcombine.low %v598_v11, %v598_v11 }
 0x909   :  { %v617_v14 = vcombine.low %v614_v12, %v614_v12  ;;  %v607_v15 = vrot.slane %v600_v13, %v1220_v28 }
 0x90b   :  { %618 = vrot.lane.b32.xlu0 %v617_v14, %s1150_s27  ;;  %615 = vrot.lane.b32.xlu1 %v607_v15, %s1148_s2 }
 0x90f   :  { %629 = vrot.lane.b32.xlu1 %v1272_v2, %s1163_s30  ;;  %626 = vperm.xlu0 %1064, %v500_v52  }
 0x913   :  { %1066 = vset.pattern.permute.xlu0 %v1166_v62 }
 0x97d   :  { %v619_v16 = vpop.permute.xlu0 %618  ;;  %v616_v17 = vpop.permute.xlu1 %615 }
 0x97e   :  { %v622_v18 = vsel %vm200_vm14, %v598_v11, %v616_v17 }
 0x97f   :  { %v624_v19 = vsel %vm204_vm15, %v622_v18, %v619_v16 }
 0x980   :  { %v634_v20 = vsel %vm116_vm6, %v624_v19, 0 }
 0x981   :  { %1014 = vmatpush3.bf16.msra.mxu1 %v634_v20  ;;  %v630_v21 = vpop.permute.xlu1 %629 }
 0x982   :  { %1019 = vmatprep.subr.bf16.mxu1 %v1147_v0 }
 0x984   :  { %1016 = vmatmul.mubr.msk.bf16.vlgmr.msra.gmra.mxu1 %vm112_vm7, %v630_v21 }
 0x985   :  { %1025 = vmatprep.mubr.msk.bf16.mxu1 %vm1149_vm2, %v1147_v0  ;;  %vm737_vm2 = vcmask 162816  }
 0x98a   :  { %v627_v22 = vpop.permute.xlu0 %626 }
 0xa44   :  { %v670_v2 = vpop.f32.mrf.mxu1 }
 0xa45   :  { %v671_v23 = vadd.f32 %v670_v2, %v627_v22 }
 0xa46   :  { %v1017_v24 = vpop.f32.mrf.mxu1 }
 0xa47   :  { %v676_v26 = vmax.f32 %v671_v23, 0.0 }
 0xa48   :  { %v673_v27 = vpop.f32.mrf.mxu1 }
 0xa49   :  { %v677_v29 = vsel %vm1216_vm12, %v676_v26, 0.0 }
 0xa4a   :  { %679 = vrot.lane.b32.xlu1 %v677_v29, %s1153_s28  ;;  %v1018_v30 = vpop.f32.mrf.mxu1 }
 0xabc   :  { %v680_v31 = vpop.permute.xlu1 %679 }
 0xabd   :  { %682 = vst.msk [vmem:[%s1392_s3 + $0xc] sm:$0xf] %vm272_vm4, %v680_v31 }
 0xac4   :  { %v683_v32 = vld [vmem:[%s1392_s3 + $0xc] sm:$0xf] }
 0xac5   :  { %v691_v33 = vld [vmem:[%s1392_s3 + $0xc] sm:$0xf]  ;;  %v953_v35 = vpack.c.bf16 %v683_v32, %v683_v32 }
 0xac6   :  { %v700_v34 = vld [vmem:[%s1392_s3 + $0xc] sm:$0xf]  ;;  %v954_v36 = vpack.c.bf16 %v691_v33, %v691_v33 }
 0xac7   :  { %v955_v37 = vpack.c.bf16 %v700_v34, %v700_v34  ;;  %v688_v39 = vrot.slane %v953_v35, 6 }
 0xac8   :  { %696 = vrot.lane.b32.xlu1 %v954_v36, %s1148_s2 }
 0xac9   :  { %v705_v40 = vrot.slane %v955_v37, 6  ;;  %690 = vst.msk [vmem:[#allocation2 + $0x10] sm:$0xc] %vm87_vm5, %v688_v39 }
 0xacb   :  { %706 = vrot.lane.b32.xlu0 %v705_v40, %s1150_s27 }
 0xacc   :  { %733 = vrot.lane.b32.xlu1 %v939_v38, %s1164_s12 }
 0xacf   :  { %735 = vrot.lane.b32.xlu0 %v732_v41, %s1164_s12 }
 0xad0   :  { %721 = vperm.xlu1 %1065, %v711_v42  }
 0xb3a   :  { %v697_v44 = vpop.permute.xlu1 %696 }
 0xb3b   :  { %699 = vst.msk [vmem:[#allocation2 + $0x14] sm:$0x3] %vm76_vm1, %v697_v44 }
 0xb3d   :  { %v707_v45 = vpop.permute.xlu0 %706 }
 0xb3e   :  { %709 = vst.msk [vmem:[#allocation2 + $0x14] sm:$0xc] %vm87_vm5, %v707_v45  ;;  %v734_v49 = vpop.permute.xlu1 %733 }
 0xb41   :  { %v736_v48 = vpop.permute.xlu0 %735 }
 0xb42   :  { %v738_v51 = vsel %vm737_vm2, %v734_v49, %v736_v48 }
 0xb45   :  { %v1076_v46 = vld [vmem:[#allocation2 + $0x10] sm:$0xff]  }
 0xb46   :  { %1020 = vmatpush3.bf16.msra.mxu1 %v1076_v46 }
 0xb47   :  { %1021 = vmatprep.subr.bf16.mxu1 %v1147_v0 }
 0xb4a   :  { %1022 = vmatpush3.bf16.msra.mxu1 %v1077_v47 }
 0xb4b   :  { %1023 = vmatprep.subr.bf16.mxu1 %v1147_v0  ;;  %v722_v52 = vpop.permute.xlu1 %721 }
 0xb4e   :  { %1024 = vmatpush3.bf16.msra.mxu1 %v1078_v50 }
 0xb51   :  { %1026 = vmatmul.mubr.msk.bf16.vlgmr.msra.gmra.mxu1 %vm757_vm10, %v738_v51 }
 0xc11   :  { %v795_v53 = vpop.f32.mrf.mxu1 }
 0xc12   :  { %v796_v54 = vadd.f32 %v795_v53, %v722_v52 }
 0xc13   :  { %v1027_v55 = vpop.f32.mrf.mxu1 }
 0xc14   :  { %v801_v56 = vmax.f32 %v796_v54, 0.0 }
 0xc15   :  { %v798_v57 = vpop.f32.mrf.mxu1 }
 0xc16   :  { %v802_v58 = vsel %vm1216_vm12, %v801_v56, 0.0 }
 0xc17   :  { %v803_v59 = vpack.c.bf16 %v802_v58, %v802_v58  ;;  %v1028_v60 = vpop.f32.mrf.mxu1 }
 0xc19   :  { %v811_v0 = vrot.slane %v803_v59, %v1220_v28 }
 0xc1b   :  { %812 = vrot.lane.b32.xlu0 %v811_v0, %s1153_s28 }
 0xc8d   :  { %v813_v61 = vpop.permute.xlu0 %812 }
 0xc8e   :  { %815 = vst.msk [vmem:[#allocation3] sm:$0x3] %vm176_vm13, %v813_v61 }
 0xc95   :  { %v816_v63 = vld [vmem:[#allocation3] sm:$0x3] }
 0xc96   :  { %v832_v1 = vrot.slane %v816_v63, %v1220_v28  ;;  %v818_v3 = vcombine.low %v816_v63, %v816_v63 }
 0xc98   :  { %v835_v4 = vcombine.low %v832_v1, %v832_v1  ;;  %v825_v5 = vrot.slane %v818_v3, %v1220_v28 }
 0xc9a   :  { %836 = vrot.lane.b32.xlu0 %v835_v4, %s1150_s27  ;;  %833 = vrot.lane.b32.xlu1 %v825_v5, %s1148_s2 }
 0xc9e   :  { %855 = vrot.lane.b32.xlu1 %v944_v6, %s1167_s13  ;;  %844 = vperm.xlu0 %1066, %v711_v42  }
 0xd0c   :  { %v837_v7 = vpop.permute.xlu0 %836  ;;  %v834_v8 = vpop.permute.xlu1 %833 }
 0xd0d   :  { %v840_v9 = vsel %vm200_vm14, %v816_v63, %v834_v8 }
 0xd0e   :  { %v842_v10 = vsel %vm204_vm15, %v840_v9, %v837_v7 }
 0xd0f   :  { %v860_v11 = vsel %vm116_vm6, %v842_v10, 0 }
 0xd10   :  { %1030 = vmatpush3.bf16.msra.mxu0 %v860_v11  ;;  %v856_v12 = vpop.permute.xlu1 %855 }
 0xd13   :  { %1032 = vmatmul.mubr.msk.bf16.vlgmr.msra.gmra.mxu0 %vm112_vm7, %v856_v12 }
 0xd19   :  { %v845_v28 = vpop.permute.xlu0 %844 }
 0xdd3   :  { %v896_v13 = vpop.f32.mrf.mxu0 }
 0xdd4   :  { %v897_v14 = vadd.f32 %v896_v13, %v845_v28 }
 0xdd5   :  { %v1033_v15 = vpop.f32.mrf.mxu0 }
 0xdd6   :  { %v902_v16 = vmax.f32 %v897_v14, 0.0 }
 0xdd7   :  { %v899_v17 = vpop.f32.mrf.mxu0 }
 0xdd8   :  { %v903_v18 = vsel %vm1216_vm12, %v902_v16, 0.0 }
 0xdd9   :  { %v1034_v19 = vpop.f32.mrf.mxu0  ;;  %905 = vrot.lane.b32.xlu1 %v903_v18, %s1153_s28 }
 0xe4b   :  { %v906_v20 = vpop.permute.xlu1 %905 }
 0xe4c   :  { %908 = vst.msk [vmem:[%s1392_s3 + $0x10] sm:$0xf] %vm272_vm4, %v906_v20 }
 0xe4d   :  { %913 = vsyncpa [#allocation5], 1 }
 0xe4e   :  { %914 = vsyncpa [#allocation7], 1 }

</bundles_post_ra>
